<compile_context>
chip_gen: v7x
topology: tpu7x:2x2x1
jax: 0.10.0
libtpu: 0.0.40
codegen_flags: <defaults>
</compile_context>

<pallas_src>
import jax
import jax.numpy as jnp
import numpy as np
from jax.experimental import pallas as pl
from jax.experimental.pallas import tpu as pltpu


# --------------------------------------------------------------------------- #
# Kernels
# --------------------------------------------------------------------------- #

def _sigmoid(z):
    # sigmoid(z) == 0.5 * (1 + tanh(z/2)): a single EUP transcendental per
    # element (no separate exp + divide), keeping the kernel HBM-bound on v7x.
    return 0.5 * (1.0 + jnp.tanh(0.5 * z))


def dice_kernel(alpha_ref, x_ref, o_ref):
    """Single-pass kernel: each block carries the FULL batch column."""
    x = x_ref[...].astype(jnp.float32)          # [B, tile_h]
    n = x.shape[0]

    # One-pass stats over dim 0: sum and sum-of-squares (single VPU pass, no
    # live `centered` temporary).
    s1 = jnp.sum(x, axis=0, keepdims=True)      # [1, tile_h]
    s2 = jnp.sum(x * x, axis=0, keepdims=True)  # [1, tile_h]
    mean = s1 * (1.0 / n)

    # Unbiased variance (torch.std default, ddof=1). Float divide so B == 1
    # gives NaN like torch instead of a trace-time ZeroDivisionError; clamp
    # guards tiny negative cancellation residue only.
    var = jnp.maximum(s2 - mean * s1, 0.0) / jnp.float32(n - 1)
    inv_std = jax.lax.rsqrt(var)                # one EUP op per feature column

    # (x - mean)/std  ==  x*inv_std - mean*inv_std  (broadcast muls only)
    norm_x = x * inv_std - mean * inv_std
    p = _sigmoid(norm_x + 1e-8)

    alpha = alpha_ref[0]
    # x*p + alpha*x*(1-p) == x * (alpha + (1-alpha)*p)   (fused blend)
    o_ref[...] = (x * (alpha + (1.0 - alpha) * p)).astype(o_ref.dtype)


def dice_stats_kernel(x_ref, s1_ref, s2_ref):
    """Two-pass path, pass 1: accumulate sum / sumsq over B tiles."""
    b = pl.program_id(1)

    @pl.when(b == 0)
    def _():
        s1_ref[...] = jnp.zeros_like(s1_ref)
        s2_ref[...] = jnp.zeros_like(s2_ref)

    x = x_ref[...].astype(jnp.float32)          # [tile_b, tile_h]
    s1_ref[...] += jnp.sum(x, axis=0, keepdims=True)
    s2_ref[...] += jnp.sum(x * x, axis=0, keepdims=True)


def dice_apply_kernel(alpha_ref, x_ref, mean_ref, inv_std_ref, o_ref):
    """Two-pass path, pass 2: elementwise apply with broadcast stats."""
    x = x_ref[...].astype(jnp.float32)
    mean = mean_ref[...]
    inv_std = inv_std_ref[...]

    norm_x = x * inv_std - mean * inv_std
    p = _sigmoid(norm_x + 1e-8)

    alpha = alpha_ref[0]
    o_ref[...] = (x * (alpha + (1.0 - alpha) * p)).astype(o_ref.dtype)


# --------------------------------------------------------------------------- #
# Tiling / budget helpers
# --------------------------------------------------------------------------- #

def _round_up(x, m):
    return (x + m - 1) // m * m


def _vmem_budget_bytes():
    """Generation-aware scoped VMEM limit."""
    try:
        info = pltpu.get_tpu_info()
        cap = getattr(info, "vmem_capacity_bytes", 128 << 20)
    except Exception:
        cap = 128 << 20
    if cap <= (64 << 20):
        return 40 << 20          # v7x-class: 64 MiB physical/TC, leave headroom
    return 64 << 20              # v5e / v6e: 128 MiB physical


def _fits_single_pass(B, dtype_bytes, budget):
    """Can full-B column tiles (tile_h=128 minimum) fit the VMEM budget?"""
    blk = B * 128
    # 2x double-buffered input + 2x output blocks + ~3 f32 temps in the body.
    need = 4 * blk * dtype_bytes + 3 * blk * 4
    return need <= budget - (4 << 20)


def _choose_tile_h(B, H_pad, dtype_bytes, target_block_bytes):
    """Largest multiple of 128 with B*tile_h*dtype within the byte budget,
    dividing H_pad, and giving >=2 grid steps when H allows."""
    per_col = max(1, B * dtype_bytes)
    t = (target_block_bytes // per_col) // 128 * 128
    t = max(128, min(t, H_pad))
    if H_pad >= 256:                                 # keep >=2 grid steps
        t = min(t, max(128, (H_pad // 2) // 128 * 128))
    while H_pad % t:
        t -= 128
    return t


def _choose_tile_h_two_pass(H_pad):
    t = min(512, H_pad)
    if H_pad >= 256:
        t = min(t, max(128, (H_pad // 2) // 128 * 128))
    while H_pad % t:
        t -= 128
    return t


# --------------------------------------------------------------------------- #
# Wrapper
# --------------------------------------------------------------------------- #

def dice_forward(x, alpha, *, target_block_bytes=2 << 20,
                 _force_two_pass=False, _max_tile_b=None):
    """x: [B, H] array, alpha: (1,) f32 parameter."""
    assert x.ndim == 2, "dice_forward expects a 2-D [batch, features] input"
    B, H = x.shape
    dtype_bytes = jnp.dtype(x.dtype).itemsize
    H_pad = _round_up(max(H, 128), 128)
    budget = _vmem_budget_bytes()

    use_single = _fits_single_pass(B, dtype_bytes, budget) and not _force_two_pass

    if use_single:
        # -------- single-pass: each tile carries the full batch column ------
        tile_h = _choose_tile_h(B, H_pad, dtype_bytes, target_block_bytes)
        x_p = x if H_pad == H else jnp.pad(x, ((0, 0), (0, H_pad - H)))

        out = pl.pallas_call(
            dice_kernel,
            out_shape=jax.ShapeDtypeStruct((B, H_pad), x.dtype),
            grid=(H_pad // tile_h,),
            in_specs=[
                pl.BlockSpec(memory_space=pltpu.SMEM),          # alpha scalar
                pl.BlockSpec((B, tile_h), lambda j: (0, j)),    # full-B column
            ],
            out_specs=pl.BlockSpec((B, tile_h), lambda j: (0, j)),
            compiler_params=pltpu.CompilerParams(
                dimension_semantics=("parallel",),
                vmem_limit_bytes=budget,
            ),
            cost_estimate=pl.CostEstimate(
                flops=10 * B * H_pad,
                transcendentals=B * H_pad,
                bytes_accessed=2 * B * H_pad * dtype_bytes,
            ),
        )(alpha, x_p)
        return out if H_pad == H else out[:, :H]

    # ------------ two-pass fallback: B-tiled stats + elementwise apply ------
    tile_h = _choose_tile_h_two_pass(H_pad)
    tile_b = target_block_bytes // (tile_h * dtype_bytes)
    tile_b = max(8, (tile_b // 8) * 8)
    if _max_tile_b is not None:
        tile_b = max(8, min(tile_b, _max_tile_b))
    tile_b = min(tile_b, _round_up(B, 8))
    B_pad = _round_up(B, tile_b)

    pad_b, pad_h = B_pad - B, H_pad - H
    x_p = x if (pad_b == 0 and pad_h == 0) else jnp.pad(x, ((0, pad_b), (0, pad_h)))

    grid = (H_pad // tile_h, B_pad // tile_b)

    # Pass 1: per-feature sum / sumsq (zero-padded rows contribute nothing).
    s1, s2 = pl.pallas_call(
        dice_stats_kernel,
        out_shape=(jax.ShapeDtypeStruct((1, H_pad), jnp.float32),
                   jax.ShapeDtypeStruct((1, H_pad), jnp.float32)),
        grid=grid,
        in_specs=[pl.BlockSpec((tile_b, tile_h), lambda j, b: (b, j))],
        out_specs=[pl.BlockSpec((1, tile_h), lambda j, b: (0, j)),
                   pl.BlockSpec((1, tile_h), lambda j, b: (0, j))],
        compiler_params=pltpu.CompilerParams(
            dimension_semantics=("parallel", "arbitrary"),
            vmem_limit_bytes=budget,
        ),
        cost_estimate=pl.CostEstimate(
            flops=3 * B_pad * H_pad,
            transcendentals=0,
            bytes_accessed=B_pad * H_pad * dtype_bytes + 8 * H_pad,
        ),
    )(x_p)

    # Tiny per-feature reductions finished in plain XLA (H-sized vectors).
    n = jnp.float32(B)
    mean = s1 / n
    var = jnp.maximum(s2 - mean * s1, 0.0) / jnp.float32(B - 1)
    inv_std = jax.lax.rsqrt(var)

    # Pass 2: elementwise apply.
    out = pl.pallas_call(
        dice_apply_kernel,
        out_shape=jax.ShapeDtypeStruct((B_pad, H_pad), x.dtype),
        grid=grid,
        in_specs=[
            pl.BlockSpec(memory_space=pltpu.SMEM),                   # alpha
            pl.BlockSpec((tile_b, tile_h), lambda j, b: (b, j)),     # x
            pl.BlockSpec((1, tile_h), lambda j, b: (0, j)),          # mean
            pl.BlockSpec((1, tile_h), lambda j, b: (0, j)),          # inv_std
        ],
        out_specs=pl.BlockSpec((tile_b, tile_h), lambda j, b: (b, j)),
        compiler_params=pltpu.CompilerParams(
            dimension_semantics=("parallel", "parallel"),
            vmem_limit_bytes=budget,
        ),
        cost_estimate=pl.CostEstimate(
            flops=8 * B_pad * H_pad,
            transcendentals=B_pad * H_pad,
            bytes_accessed=2 * B_pad * H_pad * dtype_bytes,
        ),
    )(alpha, x_p, mean, inv_std)

    return out[:B, :H] if (pad_b or pad_h) else out


# --------------------------------------------------------------------------- #
# Pure-JAX reference (torch semantics)
# --------------------------------------------------------------------------- #

def dice_ref(x, alpha):
    xf = x.astype(jnp.float32)
    mean = jnp.mean(xf, axis=0, keepdims=True)
    var = jnp.sum((xf - mean) ** 2, axis=0, keepdims=True) / (xf.shape[0] - 1)
    std = jnp.sqrt(var)
    p = jax.nn.sigmoid((xf - mean) / std + 1e-8)
    return (xf * p + alpha[0] * xf * (1.0 - p)).astype(x.dtype)


if __name__ == "__main__":
    key = jax.random.PRNGKey(0)

    # Parameter init matching nn.Parameter(torch.zeros((1,)))
    alpha = jnp.zeros((1,), dtype=jnp.float32)
    k1, k2, k3 = jax.random.split(key, 3)

    # Case 1: lane-dense H; byte-budget chooser yields tile_h=128 -> 2-step
    # parallel grid (exercises the tiled / pipelined single-pass path).
    x1 = jax.random.normal(k1, (16, 256), dtype=jnp.float32)
    out1 = jax.block_until_ready(dice_forward(x1, alpha))
    np.testing.assert_allclose(np.asarray(out1), np.asarray(dice_ref(x1, alpha)),
                               rtol=5e-5, atol=5e-5)

    # Case 2: small non-128-multiple hidden dim -> padded to 128, sliced back.
    x2 = jax.random.normal(k2, (8, 32), dtype=jnp.float32)
    out2 = jax.block_until_ready(dice_forward(x2, alpha))
    np.testing.assert_allclose(np.asarray(out2), np.asarray(dice_ref(x2, alpha)),
                               rtol=5e-5, atol=5e-5)

    # Case 3: force the large-batch two-pass fallback (small B tiles so the
    # "arbitrary" accumulation axis really iterates; B padded 20->24, H 160->256).
    x3 = jax.random.normal(k3, (20, 160), dtype=jnp.float32)
    out3 = jax.block_until_ready(
        dice_forward(x3, alpha, _force_two_pass=True, _max_tile_b=8))
    np.testing.assert_allclose(np.asarray(out3), np.asarray(dice_ref(x3, alpha)),
                               rtol=5e-5, atol=5e-5)

    print("KERNEL_OK")
</pallas_src>

<mosaic_0001>
module attributes {stable_mosaic.version = 11 : i64} {
  func.func @dice_kernel(%arg0: i32, %arg1: memref<1xf32, #tpu.memory_space<smem>>, %arg2: memref<16x128xf32, #tpu.memory_space<vmem>>, %arg3: memref<16x128xf32, #tpu.memory_space<vmem>>) attributes {dimension_semantics = [#tpu.dimension_semantics<parallel>], iteration_bounds = array<i64: 2>, scalar_prefetch = 0 : i64, scratch_operands = 0 : i64, tpu.core_type = #tpu.core_type<tc>, window_params = [{transform_indices = @transform_0, window_bounds = array<i64: 1>}, {transform_indices = @transform_1, window_bounds = array<i64: 16, 128>}, {transform_indices = @transform_2, window_bounds = array<i64: 16, 128>}]} {
    %c0 = arith.constant 0 : index
    %c0_0 = arith.constant 0 : index
    %0 = vector.load %arg2[%c0, %c0_0] : memref<16x128xf32, #tpu.memory_space<vmem>>, vector<16x128xf32>
    %cst = arith.constant dense<0.000000e+00> : vector<128xf32>
    %1 = vector.multi_reduction <add>, %0, %cst [0] : vector<16x128xf32> to vector<128xf32>
    %2 = vector.shape_cast %1 : vector<128xf32> to vector<1x128xf32>
    %3 = arith.mulf %0, %0 : vector<16x128xf32>
    %cst_1 = arith.constant dense<0.000000e+00> : vector<128xf32>
    %4 = vector.multi_reduction <add>, %3, %cst_1 [0] : vector<16x128xf32> to vector<128xf32>
    %5 = vector.shape_cast %4 : vector<128xf32> to vector<1x128xf32>
    %cst_2 = arith.constant 6.250000e-02 : f32
    %6 = vector.broadcast %cst_2 : f32 to vector<1x128xf32>
    %7 = arith.mulf %2, %6 : vector<1x128xf32>
    %8 = arith.mulf %7, %2 : vector<1x128xf32>
    %9 = arith.subf %5, %8 : vector<1x128xf32>
    %cst_3 = arith.constant 0.000000e+00 : f32
    %10 = vector.broadcast %cst_3 : f32 to vector<1x128xf32>
    %11 = arith.maximumf %9, %10 : vector<1x128xf32>
    %cst_4 = arith.constant 1.500000e+01 : f32
    %12 = vector.broadcast %cst_4 : f32 to vector<1x128xf32>
    %13 = arith.divf %11, %12 : vector<1x128xf32>
    %14 = math.rsqrt %13 : vector<1x128xf32>
    %15 = vector.broadcast %14 : vector<1x128xf32> to vector<16x128xf32>
    %16 = arith.mulf %0, %15 : vector<16x128xf32>
    %17 = arith.mulf %7, %14 : vector<1x128xf32>
    %18 = vector.broadcast %17 : vector<1x128xf32> to vector<16x128xf32>
    %19 = arith.subf %16, %18 : vector<16x128xf32>
    %cst_5 = arith.constant 9.99999993E-9 : f32
    %20 = vector.broadcast %cst_5 : f32 to vector<16x128xf32>
    %21 = arith.addf %19, %20 : vector<16x128xf32>
    %cst_6 = arith.constant 5.000000e-01 : f32
    %22 = vector.broadcast %cst_6 : f32 to vector<16x128xf32>
    %23 = arith.mulf %22, %21 : vector<16x128xf32>
    %24 = math.tanh %23 : vector<16x128xf32>
    %cst_7 = arith.constant 1.000000e+00 : f32
    %25 = vector.broadcast %cst_7 : f32 to vector<16x128xf32>
    %26 = arith.addf %25, %24 : vector<16x128xf32>
    %cst_8 = arith.constant 5.000000e-01 : f32
    %27 = vector.broadcast %cst_8 : f32 to vector<16x128xf32>
    %28 = arith.mulf %27, %26 : vector<16x128xf32>
    %c0_9 = arith.constant 0 : index
    %29 = memref.load %arg1[%c0_9] : memref<1xf32, #tpu.memory_space<smem>>
    %cst_10 = arith.constant 1.000000e+00 : f32
    %30 = arith.subf %cst_10, %29 : f32
    %31 = vector.broadcast %30 : f32 to vector<16x128xf32>
    %32 = arith.mulf %31, %28 : vector<16x128xf32>
    %33 = vector.broadcast %29 : f32 to vector<16x128xf32>
    %34 = arith.addf %33, %32 : vector<16x128xf32>
    %35 = arith.mulf %0, %34 : vector<16x128xf32>
    %c0_11 = arith.constant 0 : index
    %c0_12 = arith.constant 0 : index
    %36 = vector.load %arg3[%c0_11, %c0_12] : memref<16x128xf32, #tpu.memory_space<vmem>>, vector<16x128xf32>
    tpu.vector_store %arg3[%c0_11, %c0_12], %35 {strides = array<i32>} : memref<16x128xf32, #tpu.memory_space<vmem>>, vector<16x128xf32>,
    return
  }
  func.func @transform_0(%arg0: i32) -> i32 {
    %c0_i32 = arith.constant 0 : i32
    %c0_i32_0 = arith.constant 0 : i32
    return %c0_i32 : i32
  }
  func.func @transform_1(%arg0: i32) -> (i32, i32) {
    %c0_i32 = arith.constant 0 : i32
    %c0_i32_0 = arith.constant 0 : i32
    return %c0_i32, %arg0 : i32, i32
  }
  func.func @transform_2(%arg0: i32) -> (i32, i32) {
    %c0_i32 = arith.constant 0 : i32
    %c0_i32_0 = arith.constant 0 : i32
    return %c0_i32, %arg0 : i32, i32
  }
}

</mosaic_0001>

<bundles_post_ra>
// kernel: tpu_custom_call.1
= control target key start
LH: loop header
LB: loop body
LE: loop exit
PB: predicated region body
PF: predicated region fallthrough
CT: control target
= control target key end

     0   :  { %s662_s0 = inlined_call_operand.<no memory space> [shape: f32[1], index: 0, kind: input, shape index: {}]   ;;  %s663_s1 = inlined_call_operand.hbm [shape: f32[16,256], index: 1, kind: input, shape index: {}]   ;;  %s664_s2 = inlined_call_operand.hbm [shape: f32[16,256], index: 2, kind: output, shape index: {}]  }
   0x1   :  { %7 = sst [smem:[#allocation2]] %s662_s0 }
   0x2   :  { %8 = vsyncpa [#allocation4], 0 }
   0x3   :  { %10 = vsyncpa [#allocation4 + $0x1], 0 }
   0x4   :  { %11 = vsyncpa [#allocation5], 0 }
   0x5   :  { %13 = vsyncpa [#allocation5 + $0x1], 0  ;;  %s494_s11 = smov 0   ;;  %s496_s12 = smov 0  }
   0x6   :  { %s498_s13 = smov 0   ;;  %s500_s14 = smov 0  }
   0x7 LB: > { %s515_s0 = sadd.s32 4294967295, %s466_s14   ;;  %s300_s15 = sadd.s32 4294967294, %s466_s14   ;;  %s466_s14 = sphi %s500_s14, %s678_s14   ;;  %s462_s13 = sphi %s498_s13, %s677_s13   ;;  %s458_s12 = sphi %s496_s12, %s676_s12   ;;  %s454_s11 = sphi %s494_s11, %s675_s11  }
   0x8   : > { %s519_s16 = sadd.s32 1, %s466_s14   ;;  %s47_s17 = sadd.s32 1, %s462_s13 }
   0x9   : > { %s44_s18 = ssub.s32 %s466_s14, %s519_s16  ;;  %p54_p0 = scmp.ne.s32.totalorder %s462_s13, %s458_s12 }
   0xa   : > { %p45_p1 = scmp.eq.s32.totalorder %s44_s18, 0  ;;  %p55_p2 = scmp.eq.s32.totalorder %s466_s14, 0 }
   0xb   : > { %p60_p3 = scmp.ne.s32.totalorder %s458_s12, %s454_s11  ;;  %p61_p4 = scmp.eq.s32.totalorder %s515_s0, 0 }
   0xc   : > { %s531_s19 = scalar_select %p45_p1, %s462_s13, %s47_s17  }
   0xd   : > { %p533_p5 = por %p55_p2, %p54_p0  ;;  %p537_p6 = por %p61_p4, %p60_p3 }
   0xe   : > { %p84_p7 = scmp.eq.s32.totalorder %s515_s0, 1  ;;  %p90_p8 = scmp.eq.s32.totalorder %s300_s15, 1 }
   0xf   : > { %p324_p10 = scmp.lt.s32.totalorder %s466_s14, 2  ;;  %s113_s24 = sand.u32 1, %s462_s13  }
  0x10   : > { %p544_p11 = por %p84_p7, %p54_p0  ;;  %p548_p12 = por %p90_p8, %p60_p3 }
  0x11   : > { %s304_s25 = sshll.u32 %s466_s14, 7  ;;  %s303_s26 = sshll.u32 %s113_s24, 4 }
  0x12   : > { %s668_s22 = scalar_select %p544_p11, 1, 0 }
  0x13   : > { %s669_s23 = scalar_select %p548_p12, 1, 0 }
  0x14   : > { %s557_s29 = scalar_lea.hbm %s663_s1, %s304_s25  ;;  %s117_s30 = scalar_lea.vmem [#allocation3], %s303_s26 }
  0x15   : > { %s123_s3 = sshll.u32 %s117_s30, 4  ;;  %p561_p13 = pnand %p324_p10, %p533_p5  ;;  %s565_s3 = int_to_ptr.vmem [resolvable:$true] %s123_s3 }
  0x16   : > { %s568_s5 = scalar_lea.sflag [#allocation4], %s113_s24  ;;  %s370_s6 = scalar_lea.hbm %s557_s29, 256 }
  0x17   : > { %p371_p1 = scmp.ne.s32.totalorder %s557_s29, %s370_s6  ;;  %p372_p2 = pneg %p561_p13 }
  0x18   : > { %s375_s9 = scalar_lea.hbm %s663_s1, 512  ;;  %p376_p5 = scmp.lt.u32.totalorder %s557_s29, %s663_s1 }
  0x19   : > { %p373_p3 = pnand %p372_p2, %p371_p1  ;;  %p377_p7 = scmp.lt.u32.totalorder %s375_s9, %s370_s6 }
  0x1a   : > { %p379_p10 = scmp.lt.u32.totalorder %s370_s6, %s557_s29 }
  0x1b   : > { %p374_p4 = pneg %p373_p3  ;;  %p378_p8 = por %p377_p7, %p376_p5 }
  0x1d   : > { %p380_p9 = por %p379_p10, %p378_p8 }
  0x1f   : > { %p381_p0 = pnand %p380_p9, %p374_p4 }
  0x21   : > { %384 = shalt.err (!%p381_p0)
}
  0x22   : > { %s385_s17 = scalar_lea.vmem %s565_s3, 256  ;;  %s468_s18 = smov [#allocation3]  }
  0x23   : > { %p386_p1 = scmp.ne.s32.totalorder %s565_s3, %s385_s17  ;;  %s390_s20 = sshll.u32 %s468_s18, 4  ;;  %s391_s20 = int_to_ptr.vmem [resolvable:$false] %s390_s20 }
  0x24   : > { %s392_s24 = scalar_lea.vmem %s391_s20, 512  ;;  %p393_p11 = scmp.lt.s32.totalorder %s565_s3, %s391_s20 }
  0x25   : > { %p388_p3 = pnand %p386_p1, %p372_p2  ;;  %p394_p5 = scmp.lt.s32.totalorder %s392_s24, %s385_s17 }
  0x27   : > { %p389_p12 = pneg %p388_p3  ;;  %p395_p7 = por %p394_p5, %p393_p11 }
  0x29   : > { %p396_p8 = pnand %p395_p7, %p389_p12 }
  0x2b   : > { %399 = shalt.err (!%p396_p8)
}
  0x2c   : > { %s469_s25 = smov 256   ;;  %s470_s26 = smov 128  }
  0x2d   : > { %s471_s27 = smov 8   ;;  %p131_p9 = scmp.lt.s32.totalorder %s466_s14, 3 }
  0x2e   : > { %319 = dma.hbm_to_vmem [thread:$0]  (!%p561_p13), %s557_s29, 256, %s565_s3, %s568_s5, %s469_s25, %s470_s26, %s471_s27  }
  0x2f   : > { %p671_p0 = scmp.ge.s32.totalorder %s466_s14, 1 }
  0x31   : > { %p132_p2 = pnand %p671_p0, %p131_p9 }
  0x32   : > { %s600_s28 = sand.u32 (!%p132_p2), 1, %s458_s12  }
  0x33   : > { %135 = sbr.rel (%p132_p2) target bundleno = 141 (0x8d), region = 28  ;;  %s306_s30 = sshll.u32 (!%p132_p2), %s600_s28, 4 }
  0x34   : > { %s138_s6 = scalar_lea.sflag (!%p132_p2), [#allocation4], %s600_s28  ;;  %s141_s7 = scalar_lea.vmem (!%p132_p2), [#allocation3], %s306_s30 }
  0x3a   : > { %445 = dma.done.wait (%p537_p6), %s138_s6, 256  }
  0x3b   : > { %447 = vsyncadd (%p537_p6), %s138_s6, 4294967040  ;;  %v162_v0 = vld [vmem:[%s141_s7] sm:$0xff]  ;;  %v163_v1 = vld [vmem:[%s141_s7 + $0x8] sm:$0xff]  ;;  %s202_s21 = sld [smem:[#allocation2]]  ;;  %s161_s3 = scalar_lea.vmem [#allocation6], %s306_s30 }
  0x3c   : > { %v164_v2 = vadd.f32 %v163_v1, %v162_v0  ;;  %v171_v3 = vmul.f32 %v162_v0, %v162_v0  ;;  %v172_v4 = vmul.f32 %v163_v1, %v163_v1  ;;  %s227_s4 = sshll.u32 %s161_s3, 4  ;;  %s309_s5 = sshll.u32 %s515_s0, 7  ;;  %s613_s4 = int_to_ptr.vmem [resolvable:$true] %s227_s4 }
  0x3d   : > { %s618_s10 = scalar_lea.hbm %s664_s2, %s309_s5  ;;  %s215_s15 = scalar_lea.sflag [#allocation5], %s600_s28 }
  0x3e   : > { %v165_v5 = vrot.slane %v164_v2, 4  ;;  %v173_v6 = vadd.f32 %v172_v4, %v171_v3  ;;  %s400_s17 = scalar_lea.vmem %s613_s4, 256  ;;  %p672_p11 = scmp.ne.s32.totalorder %s668_s22, 0 }
  0x3f   : > { %p401_p6 = scmp.ne.s32.totalorder %s613_s4, %s400_s17  ;;  %s472_s0 = smov [#allocation6]  }
  0x40   : > { %v166_v7 = vadd.f32 %v165_v5, %v164_v2  ;;  %v174_v8 = vrot.slane %v173_v6, 4  ;;  %s404_s18 = sshll.u32 %s472_s0, 4  ;;  %s405_s18 = int_to_ptr.vmem [resolvable:$false] %s404_s18 }
  0x41   : > { %s203_s29 = ssub.f32 1.0, %s202_s21  ;;  %v207_v39 = vstv %s202_s21  ;;  %p402_p12 = pnand %p401_p6, %p672_p11 }
  0x42   : > { %v167_v9 = vrot.slane %v166_v7, 2  ;;  %v175_v10 = vadd.f32 %v174_v8, %v173_v6  ;;  %s406_s20 = scalar_lea.vmem %s405_s18, 512  ;;  %p407_p4 = scmp.lt.s32.totalorder %s613_s4, %s405_s18 }
  0x43   : > { %v204_v36 = vstv %s203_s29  ;;  %p403_p13 = pneg %p402_p12  ;;  %p408_p10 = scmp.lt.s32.totalorder %s406_s20, %s400_s17 }
  0x44   : > { %v168_v11 = vadd.f32 %v167_v9, %v166_v7  ;;  %v176_v12 = vrot.slane %v175_v10, 2 }
  0x45   : > { %p409_p1 = por %p408_p10, %p407_p4 }
  0x46   : > { %v169_v13 = vrot.slane %v168_v11, 1  ;;  %v177_v14 = vadd.f32 %v176_v12, %v175_v10 }
  0x47   : > { %p410_p3 = pnand %p409_p1, %p403_p13 }
  0x48   : > { %v170_v15 = vadd.f32 %v169_v13, %v168_v11  ;;  %v178_v16 = vrot.slane %v177_v14, 1 }
  0x4a   : > { %v179_v17 = vadd.f32 %v178_v16, %v177_v14  ;;  %v180_v18 = vmul.f32 0.0625, %v170_v15 }
  0x4c   : > { %v181_v19 = vmul.f32 %v180_v18, %v170_v15 }
  0x4e   : > { %v182_v20 = vsub.f32 %v179_v17, %v181_v19 }
  0x50   : > { %v183_v21 = vmax.f32 %v182_v20, 0.0 }
  0x52   : > { %v185_v22 = vmul.f32 0.06666667, %v183_v21 }
  0x54   : > { %364 = vrsqrt.f32 %v185_v22 }
  0x5e   : > { %v365_v23 = vpop.eup %364 }
  0x5f   : > { %v187_v24 = vmul.f32 %v365_v23, %v162_v0  ;;  %v189_v25 = vmul.f32 %v365_v23, %v180_v18  ;;  %v188_v26 = vmul.f32 %v365_v23, %v163_v1 }
  0x61   : > { %v190_v27 = vsub.f32 %v187_v24, %v189_v25  ;;  %v191_v28 = vsub.f32 %v188_v26, %v189_v25 }
  0x63   : > { %v192_v29 = vadd.f32 1e-08, %v190_v27  ;;  %v193_v30 = vadd.f32 1e-08, %v191_v28 }
  0x65   : > { %v194_v31 = vmul.f32 0.5, %v192_v29  ;;  %v195_v32 = vmul.f32 0.5, %v193_v30 }
  0x67   : > { %366 = vtanh.f32 %v194_v31 }
  0x68   : > { %368 = vtanh.f32 %v195_v32 }
  0x71   : > { %v367_v33 = vpop.eup %366 }
  0x72   : > { %v369_v34 = vpop.eup %368  ;;  %v198_v35 = vadd.f32 1.0, %v367_v33 }
  0x73   : > { %v199_v37 = vadd.f32 1.0, %v369_v34 }
  0x74   : > { %v200_v38 = vmul.f32 0.5, %v198_v35 }
  0x75   : > { %v201_v40 = vmul.f32 0.5, %v199_v37 }
  0x76   : > { %v205_v41 = vmul.f32 %v204_v36, %v200_v38 }
  0x77   : > { %v206_v42 = vmul.f32 %v204_v36, %v201_v40 }
  0x78   : > { %v208_v43 = vadd.f32 %v207_v39, %v205_v41 }
  0x79   : > { %v209_v44 = vadd.f32 %v207_v39, %v206_v42 }
  0x7a   : > { %v210_v45 = vmul.f32 %v208_v43, %v162_v0 }
  0x7b   : > { %v211_v46 = vmul.f32 %v209_v44, %v163_v1 }
  0x7c   : > { %212 = vst [vmem:[%s161_s3] sm:$0xff] %v210_v45 }
  0x7d   : > { %213 = vst [vmem:[%s161_s3 + $0x8] sm:$0xff] %v211_v46 }
  0x7e   : > { %413 = shalt.err (!%p410_p3)
}
  0x7f   : > { %s414_s24 = scalar_lea.hbm %s618_s10, 256  ;;  %s418_s27 = scalar_lea.hbm %s664_s2, 512 }
  0x80   : > { %p415_p5 = scmp.ne.s32.totalorder %s618_s10, %s414_s24  ;;  %p419_p9 = scmp.lt.u32.totalorder %s618_s10, %s664_s2 }
  0x81   : > { %p420_p0 = scmp.lt.u32.totalorder %s418_s27, %s414_s24  ;;  %p422_p6 = scmp.lt.u32.totalorder %s414_s24, %s618_s10 }
  0x82   : > { %p416_p7 = pnand %p415_p5, %p672_p11 }
  0x83   : > { %p421_p2 = por %p420_p0, %p419_p9 }
  0x84   : > { %p417_p8 = pneg %p416_p7 }
  0x85   : > { %p423_p12 = por %p422_p6, %p421_p2 }
  0x87   : > { %p424_p13 = pnand %p423_p12, %p417_p8 }
  0x89   : > { %427 = shalt.err (!%p424_p13)
}
  0x8a   : > { %s473_s7 = smov 128   ;;  %s474_s21 = smov 256  }
  0x8b   : > { %s475_s29 = smov 8  }
  0x8c   : > { %314 = dma.vmem_to_hbm [thread:$0]  (%p672_p11), %s613_s4, 256, %s618_s10, %s215_s15, %s473_s7, %s474_s21, %s475_s29  }
  0x8d PF: > { %s242_s3 = sand.u32 1, %s454_s11   ;;  %p673_p4 = scmp.ne.s32.totalorder %s669_s23, 0 }
  0x8e   : > { %p674_p10 = scmp.ge.s32.totalorder %s466_s14, 2  ;;  %s243_s5 = scalar_lea.sflag [#allocation5], %s242_s3 }
  0x90   : > { %p321_p1 = pnand %p674_p10, %p673_p4 }
  0x92   : > { %449 = dma.done.wait (!%p321_p1), %s243_s5, 256  }
  0x93   : > { %451 = vsyncadd (!%p321_p1), %s243_s5, 4294967040  ;;  %p16_p3 = scmp.ge.s32.totalorder %s519_s16, 4   ;;  %s675_s11 = smov %s458_s12 }
  0x94   : > { %s676_s12 = smov %s462_s13  ;;  %s677_s13 = smov %s531_s19 }
  0x95   : > { %s678_s14 = smov %s519_s16  ;;  %18 = sbr.rel (!%p16_p3) target bundleno = 7 (0x7), region = 73 }
  0x9c   :  { %248 = vsyncpa [#allocation4], 1 }
  0x9d   :  { %250 = vsyncpa [#allocation4 + $0x1], 1 }
  0x9e   :  { %251 = vsyncpa [#allocation5], 1 }
  0x9f   :  { %253 = vsyncpa [#allocation5 + $0x1], 1 }

</bundles_post_ra>
